<compile_context>
chip_gen: v7x
topology: tpu7x:2x2x1
jax: 0.10.0
libtpu: 0.0.40
codegen_flags: <defaults>
</compile_context>

<pallas_src>
import functools

import jax
import jax.numpy as jnp
import numpy as np
from jax.experimental import pallas as pl
from jax.experimental.pallas import tpu as pltpu

LANE = 128


def _round_up(x, m):
    return ((x + m - 1) // m) * m


def _fused_gap_classifier_kernel(emb_ref, w_ref, b_ref, out_ref, acc_ref, *,
                                 seq_len, batch, hidden):
    """One grid step of the fused mean-pool -> scramble -> linear head.

    emb_ref : [B, ts, H]   current sequence tile of the embeddings
    w_ref   : [H, L_pad]   scramble-absorbing (row-permuted), lane-padded weight
    b_ref   : [1, L_pad]   lane-padded bias
    out_ref : [B, L_pad]   logits (written on the last grid step only)
    acc_ref : [B, H] f32   running sequence sum (VMEM scratch, persists over grid)
    """
    k = pl.program_id(0)

    @pl.when(k == 0)
    def _init():
        acc_ref[...] = jnp.zeros_like(acc_ref)

    # Partial sequence sum for this tile, accumulated in f32 (also correct for bf16
    # inputs; on v5e the VPU has no bf16 ALU so the f32 cast is mandatory).
    e = emb_ref[...].astype(jnp.float32)          # [B, ts, H]
    acc_ref[...] += jnp.sum(e, axis=1)            # [B, H]

    @pl.when(k == pl.num_programs(0) - 1)
    def _finalize():
        # mean(1): apply 1/S exactly once, after the tiled accumulation.
        pooled = acc_ref[...] * (1.0 / seq_len)   # [B, H]

        # Reproduce `pooled.t().reshape(-1, H)` without leaving VMEM.
        # With Hb = H // B, scrambled @ W^T == A @ W_perm where
        #   A[i, r*Hb + c] = pooled[r, i*Hb + c]        (static slices + concat)
        # and W_perm is the row-permuted weight prepared outside the kernel.
        hb = hidden // batch
        rows = []
        for i in range(batch):                    # small static python loops
            pieces = [pooled[r:r + 1, i * hb:(i + 1) * hb] for r in range(batch)]
            rows.append(jnp.concatenate(pieces, axis=1))          # [1, H]
        a_mat = jnp.concatenate(rows, axis=0)                      # [B, H]

        logits = jnp.dot(a_mat, w_ref[...],
                         preferred_element_type=jnp.float32) + b_ref[...]
        out_ref[...] = logits.astype(out_ref.dtype)


def _choose_seq_tile(seq_len, row_bytes, budget_bytes=4 * 1024 * 1024):
    """Largest tile that divides S, is a multiple of 8 and fits the VMEM budget."""
    candidates = [t for t in range(8, seq_len + 1, 8)
                  if seq_len % t == 0 and t * row_bytes <= budget_bytes]
    return max(candidates) if candidates else seq_len


def fused_gap_classifier(embeddings, classifier_w, classifier_b, *, seq_tile=None):
    """Fused  mean(1) -> .t().reshape(-1, H) -> Linear  head as one pallas_call.

    embeddings:   [B, S, H]  (base_model hidden_states[-1])
    classifier_w: [L, H]     (nn.Linear weight layout)
    classifier_b: [L]
    returns logits [B, L] float32
    """
    B, S, H = embeddings.shape
    L = classifier_w.shape[0]

    if H % B != 0:
        # TODO(synk): ragged batches (B does not divide H) hit the degenerate
        # .t().reshape scramble path; fall back to plain JAX for that rare case.
        pooled = jnp.mean(embeddings.astype(jnp.float32), axis=1)
        scrambled = jnp.transpose(pooled).reshape(-1, H)
        return scrambled @ classifier_w.T.astype(jnp.float32) + classifier_b

    l_pad = _round_up(max(L, LANE), LANE)
    hb = H // B

    # Absorb the .t().reshape(-1, H) scramble into a static row permutation of the
    # classifier weight (tiny [H, L] transform; can be precomputed once per model).
    wt = jnp.transpose(classifier_w).astype(jnp.float32)         # [H, L]
    perm = np.arange(H).reshape(hb, B).T.reshape(H)              # perm[r*hb+c] = c*B + r
    w_perm = wt[perm, :]
    w_perm = jnp.pad(w_perm, ((0, 0), (0, l_pad - L)))           # lane-dense weight
    bias = jnp.pad(classifier_b.astype(jnp.float32),
                   (0, l_pad - L)).reshape(1, l_pad)

    row_bytes = B * H * embeddings.dtype.itemsize
    ts = seq_tile if seq_tile is not None else _choose_seq_tile(S, row_bytes)
    assert S % ts == 0 and (ts % 8 == 0 or ts == S), "bad sequence tile"
    num_steps = S // ts

    kernel = functools.partial(_fused_gap_classifier_kernel,
                               seq_len=S, batch=B, hidden=H)

    # VMEM budget: double-buffered input tile + resident weight/bias/out + accumulator.
    vmem_need = (2 * B * ts * H * embeddings.dtype.itemsize
                 + (H + 1 + B) * l_pad * 4 + B * H * 4)
    vmem_limit = int(min(96 * 1024 * 1024, max(32 * 1024 * 1024, 4 * vmem_need)))

    cost = pl.CostEstimate(
        flops=B * S * H + 2 * B * H * l_pad,
        transcendentals=0,
        bytes_accessed=(B * S * H * embeddings.dtype.itemsize
                        + H * l_pad * 4 + l_pad * 4 + B * l_pad * 4),
    )

    logits_padded = pl.pallas_call(
        kernel,
        out_shape=jax.ShapeDtypeStruct((B, l_pad), jnp.float32),
        grid_spec=pltpu.PrefetchScalarGridSpec(
            num_scalar_prefetch=0,
            grid=(num_steps,),
            in_specs=[
                pl.BlockSpec((B, ts, H), lambda k: (0, k, 0)),   # stream over S
                pl.BlockSpec((H, l_pad), lambda k: (0, 0)),      # resident weight
                pl.BlockSpec((1, l_pad), lambda k: (0, 0)),      # resident bias
            ],
            out_specs=pl.BlockSpec((B, l_pad), lambda k: (0, 0)),
            scratch_shapes=[pltpu.VMEM((B, H), jnp.float32)],
        ),
        compiler_params=pltpu.CompilerParams(
            dimension_semantics=("arbitrary",),   # sequence reduction axis
            vmem_limit_bytes=vmem_limit,
        ),
        cost_estimate=cost,
    )(embeddings, w_perm, bias)

    return logits_padded[:, :L]                  # drop lane padding before any softmax


def classification_forward(embeddings, classifier_w, classifier_b, labels=None,
                           *, seq_tile=None):
    """Mirrors ClassificationModel.forward given base_model hidden_states[-1]."""
    logits = fused_gap_classifier(embeddings, classifier_w, classifier_b,
                                  seq_tile=seq_tile)
    loss = None
    if labels is not None:
        # F.cross_entropy on the tiny [B, L] logits -- plain-JAX glue.
        logp = jax.nn.log_softmax(logits, axis=-1)
        loss = -jnp.mean(jnp.take_along_axis(logp, labels.reshape(-1, 1), axis=-1))
    return loss, logits


if __name__ == "__main__":
    # Small shapes consistent with the module (multi-step sequence reduction).
    B, S, H, L, VOCAB = 2, 64, 32, 6, 20

    key = jax.random.PRNGKey(0)
    k_ids, k_emb, k_w, k_b, k_lab = jax.random.split(key, 5)

    input_ids = jax.random.randint(k_ids, (B, S), 0, VOCAB, dtype=jnp.int32)
    mask = jnp.ones((B, S), dtype=jnp.int32)  # consumed by the (external) base model
    labels = jax.random.randint(k_lab, (B,), 0, L, dtype=jnp.int32)

    # TODO(synk): the pretrained BarcodeBERT base_model is external; stand it in with a
    # deterministic embedding lookup producing hidden_states[-1] ([B, S, H]).
    embed_table = jax.random.normal(k_emb, (VOCAB, H), dtype=jnp.float32) * 0.02
    embeddings = embed_table[input_ids]                     # [B, S, H]

    # Classifier parameters (nn.Linear(hidden_size, num_labels) layout).
    classifier_w = jax.random.normal(k_w, (L, H), dtype=jnp.float32) * 0.02
    classifier_b = jax.random.normal(k_b, (L,), dtype=jnp.float32) * 0.02

    loss, logits = classification_forward(embeddings, classifier_w, classifier_b,
                                          labels=labels, seq_tile=16)
    logits = jax.block_until_ready(logits)
    loss = jax.block_until_ready(loss)

    # Pure-JAX reference of the exact PyTorch semantics (incl. the .t().reshape quirk).
    pooled_ref = jnp.mean(embeddings, axis=1)
    scrambled_ref = jnp.transpose(pooled_ref).reshape(-1, H)
    logits_ref = scrambled_ref @ classifier_w.T + classifier_b
    np.testing.assert_allclose(np.asarray(logits), np.asarray(logits_ref),
                               rtol=1e-5, atol=1e-5)
    assert np.isfinite(np.asarray(loss)).all()

    print("KERNEL_OK")
</pallas_src>

<mosaic_0001>
module attributes {stable_mosaic.version = 11 : i64} {
  func.func @_fused_gap_classifier_kernel(%arg0: i32, %arg1: memref<2x16x32xf32, #tpu.memory_space<vmem>>, %arg2: memref<32x128xf32, #tpu.memory_space<vmem>>, %arg3: memref<1x128xf32, #tpu.memory_space<vmem>>, %arg4: memref<2x128xf32, #tpu.memory_space<vmem>>, %arg5: memref<2x32xf32, #tpu.memory_space<vmem>>) attributes {dimension_semantics = [#tpu.dimension_semantics<arbitrary>], iteration_bounds = array<i64: 4>, scalar_prefetch = 0 : i64, scratch_operands = 1 : i64, tpu.core_type = #tpu.core_type<tc>, window_params = [{transform_indices = @transform_0, window_bounds = array<i64: 2, 16, 32>}, {pipeline_mode = #tpu.pipeline_mode<synchronous>, transform_indices = @transform_1, window_bounds = array<i64: 32, 128>}, {pipeline_mode = #tpu.pipeline_mode<synchronous>, transform_indices = @transform_2, window_bounds = array<i64: 1, 128>}, {pipeline_mode = #tpu.pipeline_mode<synchronous>, transform_indices = @transform_3, window_bounds = array<i64: 2, 128>}]} {
    %c0_i32 = arith.constant 0 : i32
    %0 = arith.cmpi eq, %arg0, %c0_i32 : i32
    %1 = arith.extui %0 : i1 to i32
    %c0_i32_0 = arith.constant 0 : i32
    %2 = arith.cmpi ne, %1, %c0_i32_0 : i32
    scf.if %2 {
      %cst_8 = arith.constant 0.000000e+00 : f32
      %11 = vector.broadcast %cst_8 : f32 to vector<2x32xf32>
      %c0_9 = arith.constant 0 : index
      %c0_10 = arith.constant 0 : index
      %12 = vector.load %arg5[%c0_9, %c0_10] : memref<2x32xf32, #tpu.memory_space<vmem>>, vector<2x32xf32>
      tpu.vector_store %arg5[%c0_9, %c0_10], %11 {strides = array<i32>} : memref<2x32xf32, #tpu.memory_space<vmem>>, vector<2x32xf32>,
    } else {
    }
    %c0 = arith.constant 0 : index
    %c0_1 = arith.constant 0 : index
    %c0_2 = arith.constant 0 : index
    %3 = vector.load %arg1[%c0, %c0_1, %c0_2] : memref<2x16x32xf32, #tpu.memory_space<vmem>>, vector<2x16x32xf32>
    %c0_3 = arith.constant 0 : index
    %c0_4 = arith.constant 0 : index
    %4 = vector.load %arg5[%c0_3, %c0_4] : memref<2x32xf32, #tpu.memory_space<vmem>>, vector<2x32xf32>
    %cst = arith.constant dense<0.000000e+00> : vector<2x32xf32>
    %5 = vector.multi_reduction <add>, %3, %cst [1] : vector<2x16x32xf32> to vector<2x32xf32>
    %6 = arith.addf %4, %5 : vector<2x32xf32>
    %c0_5 = arith.constant 0 : index
    %c0_6 = arith.constant 0 : index
    %7 = vector.load %arg5[%c0_5, %c0_6] : memref<2x32xf32, #tpu.memory_space<vmem>>, vector<2x32xf32>
    tpu.vector_store %arg5[%c0_5, %c0_6], %6 {strides = array<i32>} : memref<2x32xf32, #tpu.memory_space<vmem>>, vector<2x32xf32>,
    %c3_i32 = arith.constant 3 : i32
    %8 = arith.cmpi eq, %arg0, %c3_i32 : i32
    %9 = arith.extui %8 : i1 to i32
    %c0_i32_7 = arith.constant 0 : i32
    %10 = arith.cmpi ne, %9, %c0_i32_7 : i32
    scf.if %10 {
      %c0_8 = arith.constant 0 : index
      %c0_9 = arith.constant 0 : index
      %11 = vector.load %arg5[%c0_8, %c0_9] : memref<2x32xf32, #tpu.memory_space<vmem>>, vector<2x32xf32>
      %cst_10 = arith.constant 1.562500e-02 : f32
      %12 = vector.broadcast %cst_10 : f32 to vector<2x32xf32>
      %13 = arith.mulf %11, %12 : vector<2x32xf32>
      %14 = vector.extract_strided_slice %13 {offsets = [0, 0], sizes = [1, 16], strides = [1, 1]} : vector<2x32xf32> to vector<1x16xf32>
      %15 = vector.extract_strided_slice %13 {offsets = [1, 0], sizes = [1, 16], strides = [1, 1]} : vector<2x32xf32> to vector<1x16xf32>
      %16 = tpu.concatenate %14, %15 in 1 : vector<1x16xf32>, vector<1x16xf32> -> vector<1x32xf32>
      %17 = vector.extract_strided_slice %13 {offsets = [0, 16], sizes = [1, 16], strides = [1, 1]} : vector<2x32xf32> to vector<1x16xf32>
      %18 = vector.extract_strided_slice %13 {offsets = [1, 16], sizes = [1, 16], strides = [1, 1]} : vector<2x32xf32> to vector<1x16xf32>
      %19 = tpu.concatenate %17, %18 in 1 : vector<1x16xf32>, vector<1x16xf32> -> vector<1x32xf32>
      %20 = tpu.concatenate %16, %19 in 0 : vector<1x32xf32>, vector<1x32xf32> -> vector<2x32xf32>
      %c0_11 = arith.constant 0 : index
      %c0_12 = arith.constant 0 : index
      %21 = vector.load %arg2[%c0_11, %c0_12] : memref<32x128xf32, #tpu.memory_space<vmem>>, vector<32x128xf32>
      %cst_13 = arith.constant dense<0.000000e+00> : vector<2x128xf32>
      %22 = tpu.matmul %20, %21, %cst_13 {dimension_numbers = #tpu.dot_dimension_numbers<[1], [0], [0], [1], [0, 0, 1, 1], [], []>} : vector<2x32xf32>, vector<32x128xf32>, vector<2x128xf32> -> vector<2x128xf32>
      %c0_14 = arith.constant 0 : index
      %c0_15 = arith.constant 0 : index
      %23 = vector.load %arg3[%c0_14, %c0_15] : memref<1x128xf32, #tpu.memory_space<vmem>>, vector<1x128xf32>
      %24 = vector.broadcast %23 : vector<1x128xf32> to vector<2x128xf32>
      %25 = arith.addf %22, %24 : vector<2x128xf32>
      %c0_16 = arith.constant 0 : index
      %c0_17 = arith.constant 0 : index
      %26 = vector.load %arg4[%c0_16, %c0_17] : memref<2x128xf32, #tpu.memory_space<vmem>>, vector<2x128xf32>
      tpu.vector_store %arg4[%c0_16, %c0_17], %25 {strides = array<i32>} : memref<2x128xf32, #tpu.memory_space<vmem>>, vector<2x128xf32>,
    } else {
    }
    return
  }
  func.func @transform_0(%arg0: i32) -> (i32, i32, i32) {
    %c0_i32 = arith.constant 0 : i32
    %c0_i32_0 = arith.constant 0 : i32
    %c0_i32_1 = arith.constant 0 : i32
    return %c0_i32, %arg0, %c0_i32_0 : i32, i32, i32
  }
  func.func @transform_1(%arg0: i32) -> (i32, i32) {
    %c0_i32 = arith.constant 0 : i32
    %c0_i32_0 = arith.constant 0 : i32
    %c0_i32_1 = arith.constant 0 : i32
    return %c0_i32, %c0_i32_0 : i32, i32
  }
  func.func @transform_2(%arg0: i32) -> (i32, i32) {
    %c0_i32 = arith.constant 0 : i32
    %c0_i32_0 = arith.constant 0 : i32
    %c0_i32_1 = arith.constant 0 : i32
    return %c0_i32, %c0_i32_0 : i32, i32
  }
  func.func @transform_3(%arg0: i32) -> (i32, i32) {
    %c0_i32 = arith.constant 0 : i32
    %c0_i32_0 = arith.constant 0 : i32
    %c0_i32_1 = arith.constant 0 : i32
    return %c0_i32, %c0_i32_0 : i32, i32
  }
}

</mosaic_0001>

<bundles_post_ra>
// kernel: tpu_custom_call.1
= control target key start
LH: loop header
LB: loop body
LE: loop exit
PB: predicated region body
PF: predicated region fallthrough
CT: control target
= control target key end

     0   :  { %8 = vsyncpa [#allocation5], 0  ;;  %s560_s12 = smov 0   ;;  %s562_s13 = smov 0   ;;  %s654_s0 = inlined_call_operand.vmem [shape: f32[2,64,32], index: 0, kind: input, shape index: {}]   ;;  %s655_s1 = inlined_call_operand.vmem [shape: f32[32,128], index: 1, kind: input, shape index: {}]   ;;  %s656_s2 = inlined_call_operand.vmem [shape: f32[1,128], index: 2, kind: input, shape index: {}]   ;;  %s657_s3 = inlined_call_operand.hbm [shape: f32[2,128], index: 3, kind: output, shape index: {}]  }
   0x1   :  { %s564_s14 = smov 0  }
   0x2 LB: > { %s576_s15 = sadd.s32 4294967295, %s531_s14   ;;  %s579_s16 = sadd.s32 1, %s531_s14   ;;  %s531_s14 = sphi %s564_s14, %s660_s14   ;;  %s527_s13 = sphi %s562_s13, %s659_s13   ;;  %s523_s12 = sphi %s560_s12, %s658_s12  }
   0x3   : > { %s18_s17 = ssub.s32 %s531_s14, %s579_s16  ;;  %s21_s18 = sadd.s32 1, %s527_s13 }
   0x4   : > { %p19_p0 = scmp.eq.s32.totalorder %s18_s17, 0  ;;  %p28_p1 = scmp.ne.s32.totalorder %s527_s13, %s523_s12 }
   0x5   : > { %p29_p2 = scmp.eq.s32.totalorder %s531_s14, 0  ;;  %p405_p4 = scmp.ge.s32.totalorder %s531_s14, 4 }
   0x6   : > { %s588_s19 = scalar_select %p19_p0, %s527_s13, %s21_s18  }
   0x7   : > { %p30_p3 = por %p29_p2, %p28_p1  ;;  %123 = sbr.rel (%p405_p4) target bundleno = 21 (0x15), region = 24 }
   0xe   : > { %126 = sbr.rel (!%p30_p3) target bundleno = 21 (0x15), region = 28  ;;  %s128_s20 = sand.u32 (%p30_p3), 1, %s527_s13  }
   0xf   : > { %s419_s21 = sshll.u32 (%p30_p3), %s531_s14, 4  ;;  %s406_s22 = sshll.u32 (%p30_p3), %s128_s20, 5 }
  0x10   : > { %s133_s25 = scalar_lea.vmem (%p30_p3), %s654_s0, %s419_s21  ;;  %s130_s26 = scalar_lea.vmem (%p30_p3), [#allocation3], %s406_s22 }
  0x11   : > { %v167_v0 = vld [vmem:[%s133_s25] sm:$0xff] (%p30_p3)  ;;  %v169_v1 = vld [vmem:[%s133_s25 + $0x8] sm:$0xff] (%p30_p3) }
  0x12   : > { %v171_v2 = vld [vmem:[%s133_s25 + $0x40] sm:$0xff] (%p30_p3)  ;;  %168 = vst [vmem:[%s130_s26] sm:$0xff] (%p30_p3), %v167_v0  ;;  %170 = vst [vmem:[%s130_s26 + $0x8] sm:$0xff] (%p30_p3), %v169_v1  ;;  %v173_v3 = vld [vmem:[%s133_s25 + $0x48] sm:$0xff] (%p30_p3) }
  0x13   : > { %172 = vst [vmem:[%s130_s26 + $0x10] sm:$0xff] (%p30_p3), %v171_v2  ;;  %174 = vst [vmem:[%s130_s26 + $0x18] sm:$0xff] (%p30_p3), %v173_v3 }
  0x15 PF: > { %p409_p5 = scmp.ge.s32.totalorder %s531_s14, 1  ;;  %p179_p6 = scmp.lt.s32.totalorder %s531_s14, 5 }
  0x17   : > { %p180_p7 = pnand %p409_p5, %p179_p6 }
  0x18   : > { %s186_s27 = sand.u32 (!%p180_p7), 1, %s523_s12   ;;  %p411_p8 = scmp.ne.s32.totalorder (!%p180_p7), %s576_s15, 0 }
  0x19   : > { %183 = sbr.rel (%p180_p7) target bundleno = 430 (0x1ae), region = 66  ;;  %s410_s28 = sshll.u32 (!%p180_p7), %s186_s27, 5 }
  0x1a   : > { %s188_s29 = scalar_lea.vmem (!%p180_p7), [#allocation3], %s410_s28 }
  0x20   : > { %208 = sbr.rel (%p411_p8) target bundleno = 39 (0x27), region = 74  ;;  %vm209_vm0 = vcmask (!%p411_p8), 254976   ;;  %v533_v4 = vmov (!%p411_p8), 0.0  }
  0x21   : > { %210 = vst.msk [vmem:[#allocation2] sm:$0x3] (!%p411_p8), %vm209_vm0, %v533_v4 }
  0x27 PF: > { %v211_v5 = vld [vmem:[%s188_s29] sm:$0xff]  ;;  %v212_v6 = vld [vmem:[%s188_s29 + $0x8] sm:$0xff]  ;;  %v213_v7 = vld [vmem:[%s188_s29 + $0x10] sm:$0xff]  ;;  %vm216_vm1 = vcmask 261120   ;;  %vm237_vm2 = vcmask 1041409   ;;  %vm241_vm3 = vcmask 254976  }
  0x28   : > { %v214_v8 = vld [vmem:[%s188_s29 + $0x18] sm:$0xff]  ;;  %v217_v9 = vsel %vm216_vm1, %v211_v5, 0.0  ;;  %v218_v10 = vsel %vm216_vm1, %v212_v6, 0.0  ;;  %v226_v11 = vsel %vm216_vm1, %v213_v7, 0.0  ;;  %p412_p9 = scmp.ne.s32.totalorder %s576_s15, 3 }
  0x29   : > { %v219_v12 = vadd.f32 %v218_v10, %v217_v9  ;;  %v227_v13 = vsel %vm216_vm1, %v214_v8, 0.0  ;;  %v215_v26 = vld [vmem:[#allocation2] sm:$0x3]  ;;  %v534_v33 = vmov (!%p412_p9), 0.0|0.0   ;;  %v267_v34 = vld [vmem:[%s655_s1 + $0x8] sm:$0xff] (!%p412_p9)  ;;  %v268_v35 = vld [vmem:[%s655_s1 + $0x10] sm:$0xff] (!%p412_p9) }
  0x2a   : > { %v228_v14 = vadd.f32 %v227_v13, %v226_v11  ;;  %v266_v31 = vld [vmem:[%s655_s1] sm:$0xff] (!%p412_p9)  ;;  %436 = vmatprep.subr.bf16.mxu0 (!%p412_p9), %v534_v33  ;;  %v269_v36 = vld [vmem:[%s655_s1 + $0x18] sm:$0xff] (!%p412_p9)  ;;  %s535_s11 = smov (!%p412_p9), 112   ;;  %vm536_vm4 = vmmov (!%p412_p9), 0   ;;  %v537_v39 = vmov (!%p412_p9), 0.0   ;;  %s538_s12 = smov (!%p412_p9), 16  }
  0x2b   : > { %v220_v15 = vrot.slane %v219_v12, 4  ;;  %v437_v37 = vpack.c.bf16 (!%p412_p9), %v267_v34, %v266_v31  ;;  %433 = vmatprep.mubr.msk.f32.mxu0 (!%p412_p9), %vm536_vm4, %v537_v39  ;;  %v440_v40 = vpack.c.bf16 (!%p412_p9), %v269_v36, %v268_v35  ;;  %vm254_vm5 = vcmask (!%p412_p9), 130048   ;;  %v413_v47 = vld [vmem:[%s656_s2] ss:$0 sm:$0xff] (!%p412_p9) }
  0x2c   : > { %v229_v16 = vrot.slane %v228_v14, 4  ;;  %vm264_vm6 = vcmask (!%p412_p9), 1040384  }
  0x2d   : > { %v221_v17 = vadd.f32 %v220_v15, %v219_v12  ;;  %438 = vmatpush3.bf16.msra.mxu0 (!%p412_p9), %v437_v37 }
  0x2e   : > { %v230_v18 = vadd.f32 %v229_v16, %v228_v14  ;;  %439 = vmatprep.subr.bf16.mxu0 (!%p412_p9), %v534_v33 }
  0x2f   : > { %v222_v19 = vrot.slane %v221_v17, 2 }
  0x30   : > { %v231_v20 = vrot.slane %v230_v18, 2 }
  0x31   : > { %v223_v21 = vadd.f32 %v222_v19, %v221_v17  ;;  %441 = vmatpush3.bf16.msra.mxu0 (!%p412_p9), %v440_v40 }
  0x32   : > { %v232_v22 = vadd.f32 %v231_v20, %v230_v18 }
  0x33   : > { %v224_v23 = vrot.slane %v223_v21, 1 }
  0x34   : > { %v233_v24 = vrot.slane %v232_v22, 1 }
  0x35   : > { %v225_v25 = vadd.f32 %v224_v23, %v223_v21  ;;  %246 = sbr.rel (%p412_p9) target bundleno = 405 (0x195), region = 78 }
  0x36   : > { %v234_v27 = vadd.f32 %v233_v24, %v232_v22 }
  0x38   : > { %v238_v28 = vsel %vm237_vm2, %v234_v27, %v225_v25 }
  0x39   : > { %v240_v29 = vadd.f32 %v238_v28, %v215_v26 }
  0x3b   : > { %242 = vst.msk [vmem:[#allocation2] sm:$0x3] %vm241_vm3, %v240_v29 }
  0x42   : > { %v247_v30 = vld [vmem:[#allocation2] sm:$0x3] }
  0x43   : > { %v248_v32 = vmul.f32 0.015625, %v247_v30 }
  0x45   : > { %256 = vrot.lane.b32.xlu0 %v248_v32, %s535_s11  ;;  %v250_v38 = vrot.slane %v248_v32, 1 }
  0x49   : > { %251 = vrot.lane.b32.xlu0 %v250_v38, %s538_s12 }
  0xb7   : > { %v257_v41 = vpop.permute.xlu0 %256 }
  0xb8   : > { %v260_v42 = vsel %vm254_vm5, %v257_v41, %v250_v38 }
  0xb9   : > { %v262_v43 = vrot.slane %v260_v42, 7 }
  0xbb   : > { %v252_v44 = vpop.permute.xlu0 %251 }
  0xbc   : > { %v255_v45 = vsel %vm254_vm5, %v248_v32, %v252_v44 }
  0xbd   : > { %v265_v46 = vsel %vm264_vm6, %v255_v45, %v262_v43 }
  0xbe   : > { %434 = vmatmul.mubr.msk.f32.vlgmr.msra.gmra.mrb[0].mxu0 %vm216_vm1, %v265_v46 }
 0x191   : > { %v346_v48 = vpop.f32.mrb[0].mxu0 }
 0x192   : > { %v347_v49 = vadd.f32 %v413_v47, %v346_v48  ;;  %v435_v50 = vpop.f32.mrb[1].mxu0 }
 0x194   : > { %350 = vst [vmem:[#allocation4] sm:$0x3] %v347_v49 }
 0x195 PF: > { %p446_p10 = scmp.eq.s32.totalorder %s576_s15, 3  ;;  %s539_s18 = smov [#allocation4]  }
 0x196   : > { %s358_s20 = sshll.u32 %s539_s18, 4  ;;  %s359_s20 = int_to_ptr.vmem [resolvable:$true] %s358_s20 }
 0x197   : > { %s479_s21 = scalar_lea.vmem %s359_s20, 32  ;;  %p486_p0 = scmp.lt.s32.totalorder %s359_s20, %s359_s20 }
 0x198   : > { %p480_p11 = scmp.ne.s32.totalorder %s359_s20, %s479_s21  ;;  %p487_p1 = scmp.lt.s32.totalorder %s479_s21, %s479_s21 }
 0x19a   : > { %p481_p12 = pnand %p480_p11, %p446_p10  ;;  %p488_p2 = por %p487_p1, %p486_p0 }
 0x19c   : > { %p482_p13 = pneg %p481_p12 }
 0x19e   : > { %p489_p3 = pnand %p488_p2, %p482_p13 }
 0x1a0   : > { %492 = shalt.err (!%p489_p3)
}
 0x1a1   : > { %s493_s24 = scalar_lea.hbm %s657_s3, 32 }
 0x1a2   : > { %p494_p4 = scmp.ne.s32.totalorder %s657_s3, %s493_s24  ;;  %p499_p7 = scmp.lt.u32.totalorder %s493_s24, %s657_s3 }
 0x1a4   : > { %p495_p5 = pnand %p494_p4, %p446_p10 }
 0x1a6   : > { %p496_p6 = pneg %p495_p5 }
 0x1a8   : > { %p501_p8 = pnand %p499_p7, %p496_p6 }
 0x1aa   : > { %504 = shalt.err (!%p501_p8)
}
 0x1ab   : > { %443 = dma.vmem_to_hbm [thread:$0]  (%p446_p10), %s359_s20, 32, %s657_s3, [#allocation5]  }
 0x1ac   : > { %518 = dma.done.wait (%p446_p10), [#allocation5], 32  }
 0x1ad   : > { %520 = vsyncadd (%p446_p10), [#allocation5], 4294967264 }
 0x1ae PF: > { %p11_p9 = scmp.ge.s32.totalorder %s579_s16, 6   ;;  %s658_s12 = smov %s527_s13 }
 0x1af   : > { %s659_s13 = smov %s588_s19  ;;  %s660_s14 = smov %s579_s16 }
 0x1b0   :  { %13 = sbr.rel (!%p11_p9) target bundleno = 2 (0x2), region = 110 }
 0x1b7   :  { %371 = vsyncpa [#allocation5], 1 }
 0x1b8   :  { %373 = vsyncpa [#allocation5 + $0x1], 1 }

</bundles_post_ra>
